<compile_context>
chip_gen: v6e
topology: v6e:2x2x1
jax: 0.10.0
libtpu: 0.0.40
codegen_flags: <defaults>
</compile_context>

<pallas_src>
import jax
import jax.numpy as jnp
from jax import lax
from jax.experimental import pallas as pl
from jax.experimental.pallas import tpu as pltpu

_EPS_IN = 1e-3   # InstanceNorm2d eps
_EPS_BN = 1e-5   # BatchNorm2d eps


def diff_pool_stats_kernel(x_ref, mu_ref, var_ref):
    """Per-(b, c) InstanceNorm statistics over N for one batch block."""
    x = x_ref[0].astype(jnp.float32)                          # (C, N)
    mu = jnp.mean(x, axis=-1, keepdims=True)                  # (C, 1)
    ex2 = jnp.mean(x * x, axis=-1, keepdims=True)             # (C, 1)
    var = jnp.maximum(ex2 - mu * mu, 0.0)                     # biased variance, (C, 1)
    mu_ref[0] = mu
    var_ref[0] = var


def diff_pool_scale_kernel(var_ref, scale_ref):
    """Fold train-mode BatchNorm into one per-(b, c) scale (runs once, O(B*C))."""
    var = var_ref[...]                                         # (B, C, 1)
    # mu_bn == 0;  var_bn[c] = mean_b( var_in[b,c] / (var_in[b,c] + eps_in) )
    var_bn = jnp.mean(var / (var + _EPS_IN), axis=0, keepdims=True)   # (1, C, 1)
    scale_ref[...] = lax.rsqrt(var + _EPS_IN) * lax.rsqrt(var_bn + _EPS_BN)


def diff_pool_apply_kernel(mu_ref, scale_ref, x_ref, w_ref, bias_ref, out_ref):
    """Fused normalize -> ReLU -> 1x1 conv -> softmax(N) -> pooling matmul for one batch."""
    C = x_ref.shape[1]
    N = x_ref.shape[2]
    P = w_ref.shape[0]

    mu_b = mu_ref[0]                                           # (C, 1)
    scale_b = scale_ref[0]                                     # (C, 1)  (IN*BN scale, prefolded)

    x_b = x_ref[0].astype(jnp.float32)                         # (C, N)
    h = jnp.maximum((x_b - mu_b) * scale_b, 0.0)               # fused IN+BN+ReLU, one pass

    # --- 1x1 Conv: embed[p, n] = sum_c w[p, c] * h[c, n] + bias[p] ---
    w = w_ref[...].astype(jnp.float32)                         # (P, C), single tile (no B broadcast)
    if C <= 8:
        # K = C is tiny: keep it on the VPU (outer-product accumulation) instead of
        # paying MXU push/drain latency for a <<1%-utilized matmul.
        acc = jnp.zeros((P, N), jnp.float32)
        for c in range(C):                                     # static unroll
            acc = acc + w[:, c:c + 1] * h[c:c + 1, :]
        embed = acc + bias_ref[...]
    else:
        embed = jnp.dot(w, h, preferred_element_type=jnp.float32) + bias_ref[...]

    # --- softmax over N (PyTorch dim=2) ---
    m = jnp.max(embed, axis=-1, keepdims=True)
    e = jnp.exp(embed - m)
    s = e * pl.reciprocal(jnp.sum(e, axis=-1, keepdims=True), approx=True)   # (P, N)

    # --- out[c, p] = sum_n x[c, n] * S[p, n]  (contract lane axis of both; no transpose) ---
    out = lax.dot_general(x_b, s, (((1,), (1,)), ((), ())),
                          preferred_element_type=jnp.float32)  # (C, P)
    out_ref[0] = out.astype(out_ref.dtype)


def diff_pool_forward(x_nchw, w, bias):
    """x_nchw: (B, C, N, 1) float32; w: (P, C); bias: (P,) -> (B, C, P, 1)."""
    B, C, N, W = x_nchw.shape
    assert W == 1, "diff_pool expects trailing spatial dim of size 1 (NCHW with W=1)"
    P = w.shape[0]

    x3 = x_nchw[..., 0]                                        # (B, C, N)
    w2 = w.reshape(P, C).astype(jnp.float32)
    b2 = bias.reshape(P, 1).astype(jnp.float32)

    parallel = pltpu.CompilerParams(dimension_semantics=("parallel",))

    # ---- Pass 1: per-(b, c) InstanceNorm mean/var, gridded over B ----
    mu, var = pl.pallas_call(
        diff_pool_stats_kernel,
        grid=(B,),
        in_specs=[pl.BlockSpec((1, C, N), lambda b: (b, 0, 0))],
        out_specs=[pl.BlockSpec((1, C, 1), lambda b: (b, 0, 0)),
                   pl.BlockSpec((1, C, 1), lambda b: (b, 0, 0))],
        out_shape=[jax.ShapeDtypeStruct((B, C, 1), jnp.float32),
                   jax.ShapeDtypeStruct((B, C, 1), jnp.float32)],
        compiler_params=parallel,
    )(x3)

    # ---- Pass 2: fold train-mode BN into one per-(b, c) scale (single tiny step) ----
    scale = pl.pallas_call(
        diff_pool_scale_kernel,
        grid=(1,),
        in_specs=[pl.BlockSpec((B, C, 1), lambda i: (0, 0, 0))],
        out_specs=pl.BlockSpec((B, C, 1), lambda i: (0, 0, 0)),
        out_shape=jax.ShapeDtypeStruct((B, C, 1), jnp.float32),
    )(var)

    # ---- Pass 3: normalize -> ReLU -> conv -> softmax -> pool, gridded over B ----
    out = pl.pallas_call(
        diff_pool_apply_kernel,
        grid=(B,),
        in_specs=[
            pl.BlockSpec((1, C, 1), lambda b: (b, 0, 0)),      # mu_in  (blocked over B)
            pl.BlockSpec((1, C, 1), lambda b: (b, 0, 0)),      # fused IN*BN scale (blocked over B)
            pl.BlockSpec((1, C, N), lambda b: (b, 0, 0)),      # x
            pl.BlockSpec((P, C), lambda b: (0, 0)),            # conv weight
            pl.BlockSpec((P, 1), lambda b: (0, 0)),            # conv bias
        ],
        out_specs=pl.BlockSpec((1, C, P), lambda b: (b, 0, 0)),
        out_shape=jax.ShapeDtypeStruct((B, C, P), x_nchw.dtype),
        compiler_params=parallel,
    )(mu, scale, x3, w2, b2)

    return out[..., None]                                      # (B, C, P, 1)


def diff_pool_reference(x_nchw, w, bias):
    """Pure-JAX reference mirroring the PyTorch forward (train mode), un-folded math."""
    x = x_nchw[..., 0].astype(jnp.float32)                     # (B, C, N)
    mu = jnp.mean(x, axis=2, keepdims=True)
    var = jnp.mean((x - mu) ** 2, axis=2, keepdims=True)
    h = (x - mu) / jnp.sqrt(var + _EPS_IN)
    mu_b = jnp.mean(h, axis=(0, 2), keepdims=True)
    var_b = jnp.mean((h - mu_b) ** 2, axis=(0, 2), keepdims=True)
    h = (h - mu_b) / jnp.sqrt(var_b + _EPS_BN)
    h = jnp.maximum(h, 0.0)
    embed = jnp.einsum('pc,bcn->bpn', w, h) + bias[None, :, None]
    s = jax.nn.softmax(embed, axis=2)
    out = jnp.einsum('bcn,bpn->bcp', x, s)
    return out[..., None]


if __name__ == "__main__":
    key = jax.random.PRNGKey(0)
    kx, kw, kb = jax.random.split(key, 3)

    B, C, N, P = 2, 4, 16, 8                                   # in_channel=4, output_points=8
    x = jax.random.normal(kx, (B, C, N, 1), dtype=jnp.float32)
    # Deterministic synthetic parameters for the 1x1 Conv2d (weight (P, C, 1, 1) -> (P, C)).
    w = 0.1 * jax.random.normal(kw, (P, C), dtype=jnp.float32)
    bias = 0.05 * jax.random.normal(kb, (P,), dtype=jnp.float32)

    out = diff_pool_forward(x, w, bias)
    out = jax.block_until_ready(out)

    ref = diff_pool_reference(x, w, bias)
    assert out.shape == (B, C, P, 1), out.shape
    # Tolerance accounts for the algebraic BN fold and the approx softmax reciprocal.
    assert jnp.allclose(out, ref, atol=1e-3, rtol=1e-3), "Pallas output mismatch vs reference"

    print("KERNEL_OK")
</pallas_src>

<mosaic_0001>
module attributes {stable_mosaic.version = 11 : i64} {
  func.func @diff_pool_stats_kernel(%arg0: i32, %arg1: memref<1x4x16xf32, #tpu.memory_space<vmem>>, %arg2: memref<1x4x1xf32, #tpu.memory_space<vmem>>, %arg3: memref<1x4x1xf32, #tpu.memory_space<vmem>>) attributes {dimension_semantics = [#tpu.dimension_semantics<parallel>], iteration_bounds = array<i64: 2>, scalar_prefetch = 0 : i64, scratch_operands = 0 : i64, tpu.core_type = #tpu.core_type<tc>, window_params = [{transform_indices = @transform_0, window_bounds = array<i64: 1, 4, 16>}, {transform_indices = @transform_1, window_bounds = array<i64: 1, 4, 1>}, {transform_indices = @transform_2, window_bounds = array<i64: 1, 4, 1>}]} {
    %c0 = arith.constant 0 : index
    %c0_0 = arith.constant 0 : index
    %c0_1 = arith.constant 0 : index
    %0 = vector.load %arg1[%c0, %c0_0, %c0_1] : memref<1x4x16xf32, #tpu.memory_space<vmem>>, vector<1x4x16xf32>
    %1 = vector.shape_cast %0 : vector<1x4x16xf32> to vector<4x16xf32>
    %cst = arith.constant dense<0.000000e+00> : vector<4xf32>
    %2 = vector.multi_reduction <add>, %1, %cst [1] : vector<4x16xf32> to vector<4xf32>
    %3 = vector.shape_cast %2 : vector<4xf32> to vector<4x1xf32>
    %cst_2 = arith.constant 1.600000e+01 : f32
    %4 = vector.broadcast %cst_2 : f32 to vector<4x1xf32>
    %5 = arith.divf %3, %4 : vector<4x1xf32>
    %6 = arith.mulf %1, %1 : vector<4x16xf32>
    %cst_3 = arith.constant dense<0.000000e+00> : vector<4xf32>
    %7 = vector.multi_reduction <add>, %6, %cst_3 [1] : vector<4x16xf32> to vector<4xf32>
    %8 = vector.shape_cast %7 : vector<4xf32> to vector<4x1xf32>
    %cst_4 = arith.constant 1.600000e+01 : f32
    %9 = vector.broadcast %cst_4 : f32 to vector<4x1xf32>
    %10 = arith.divf %8, %9 : vector<4x1xf32>
    %11 = arith.mulf %5, %5 : vector<4x1xf32>
    %12 = arith.subf %10, %11 : vector<4x1xf32>
    %cst_5 = arith.constant 0.000000e+00 : f32
    %13 = vector.broadcast %cst_5 : f32 to vector<4x1xf32>
    %14 = arith.maximumf %12, %13 : vector<4x1xf32>
    %c0_6 = arith.constant 0 : index
    %c0_7 = arith.constant 0 : index
    %c0_8 = arith.constant 0 : index
    %15 = vector.load %arg2[%c0_6, %c0_7, %c0_8] : memref<1x4x1xf32, #tpu.memory_space<vmem>>, vector<1x4x1xf32>
    %16 = vector.shape_cast %15 : vector<1x4x1xf32> to vector<4x1xf32>
    %17 = vector.shape_cast %5 : vector<4x1xf32> to vector<1x4x1xf32>
    tpu.vector_store %arg2[%c0_6, %c0_7, %c0_8], %17 {strides = array<i32>} : memref<1x4x1xf32, #tpu.memory_space<vmem>>, vector<1x4x1xf32>,
    %c0_9 = arith.constant 0 : index
    %c0_10 = arith.constant 0 : index
    %c0_11 = arith.constant 0 : index
    %18 = vector.load %arg3[%c0_9, %c0_10, %c0_11] : memref<1x4x1xf32, #tpu.memory_space<vmem>>, vector<1x4x1xf32>
    %19 = vector.shape_cast %18 : vector<1x4x1xf32> to vector<4x1xf32>
    %20 = vector.shape_cast %14 : vector<4x1xf32> to vector<1x4x1xf32>
    tpu.vector_store %arg3[%c0_9, %c0_10, %c0_11], %20 {strides = array<i32>} : memref<1x4x1xf32, #tpu.memory_space<vmem>>, vector<1x4x1xf32>,
    return
  }
  func.func @transform_0(%arg0: i32) -> (i32, i32, i32) {
    %c0_i32 = arith.constant 0 : i32
    %c0_i32_0 = arith.constant 0 : i32
    %c0_i32_1 = arith.constant 0 : i32
    return %arg0, %c0_i32, %c0_i32_0 : i32, i32, i32
  }
  func.func @transform_1(%arg0: i32) -> (i32, i32, i32) {
    %c0_i32 = arith.constant 0 : i32
    %c0_i32_0 = arith.constant 0 : i32
    %c0_i32_1 = arith.constant 0 : i32
    return %arg0, %c0_i32, %c0_i32_0 : i32, i32, i32
  }
  func.func @transform_2(%arg0: i32) -> (i32, i32, i32) {
    %c0_i32 = arith.constant 0 : i32
    %c0_i32_0 = arith.constant 0 : i32
    %c0_i32_1 = arith.constant 0 : i32
    return %arg0, %c0_i32, %c0_i32_0 : i32, i32, i32
  }
}

</mosaic_0001>

<bundles_post_ra>
// kernel: tpu_custom_call.1
= control target key start
LH: loop header
LB: loop body
LE: loop exit
PB: predicated region body
PF: predicated region fallthrough
CT: control target
= control target key end

     0   :  { %8 = vsyncpa [#allocation3], 0  ;;  %s517_s0 = inlined_call_operand.hbm [shape: f32[2,4,16], index: 0, kind: input, shape index: {}]   ;;  %s518_s1 = inlined_call_operand.vmem [shape: f32[2,4,1], index: 1, kind: output, shape index: {0}]   ;;  %s519_s2 = inlined_call_operand.vmem [shape: f32[2,4,1], index: 2, kind: output, shape index: {1}]  }
   0x1   :  { %10 = vsyncpa [#allocation3 + $0x1], 0  ;;  %s414_s9 = smov 0   ;;  %s416_s10 = smov 0  }
   0x2   :  { %s418_s11 = smov 0   ;;  %s420_s12 = smov 0  }
   0x3 LB: > { %s433_s13 = sadd.s32 4294967295, %s396_s12   ;;  %s436_s14 = sadd.s32 1, %s396_s12   ;;  %s396_s12 = sphi %s420_s12, %s529_s12   ;;  %s392_s11 = sphi %s418_s11, %s528_s11   ;;  %s388_s10 = sphi %s416_s10, %s527_s10   ;;  %s384_s9 = sphi %s414_s9, %s526_s9  }
   0x4   : > { %s20_s15 = ssub.s32 %s396_s12, %s436_s14  ;;  %s23_s16 = sadd.s32 1, %s392_s11 }
   0x5   : > { %p21_p0 = scmp.eq.s32.totalorder %s20_s15, 0  ;;  %p30_p1 = scmp.ne.s32.totalorder %s392_s11, %s388_s10 }
   0x6   : > { %p31_p2 = scmp.eq.s32.totalorder %s396_s12, 0  ;;  %p36_p3 = scmp.ne.s32.totalorder %s388_s10, %s384_s9 }
   0x7   : > { %s446_s17 = scalar_select %p21_p0, %s392_s11, %s23_s16  }
   0x8   : > { %p32_p4 = por %p31_p2, %p30_p1  ;;  %p37_p5 = scmp.eq.s32.totalorder %s433_s13, 0 }
   0x9   : > { %p301_p6 = scmp.lt.s32.totalorder %s396_s12, 2  ;;  %s112_s19 = sand.u32 1, %s392_s11  }
   0xa   : > { %p450_p7 = por %p37_p5, %p36_p3  ;;  %s287_s20 = sshll.u32 %s112_s19, 2 }
   0xb   : > { %s288_s21 = sshll.u32 %s396_s12, 6  ;;  %s116_s25 = scalar_lea.vmem [#allocation2], %s287_s20 }
   0xc   : > { %s521_s18 = scalar_select %p450_p7, 1, 0 }
   0xd   : > { %s459_s24 = scalar_lea.hbm %s517_s0, %s288_s21  ;;  %s123_s26 = sshll.u32 %s116_s25, 4  ;;  %s461_s26 = int_to_ptr.vmem [resolvable:$true] %s123_s26 }
   0xe   : > { %p463_p8 = pnand %p301_p6, %p32_p4  ;;  %s113_s28 = scalar_lea.sflag [#allocation3], %s112_s19 }
   0xf   : > { %s334_s29 = scalar_lea.hbm %s459_s24, 64  ;;  %s339_s4 = scalar_lea.hbm %s517_s0, 128 }
  0x10   : > { %p335_p11 = scmp.ne.s32.totalorder %s459_s24, %s334_s29  ;;  %p336_p12 = pneg %p463_p8 }
  0x11   : > { %p340_p1 = scmp.lt.s32.totalorder %s459_s24, %s517_s0  ;;  %p341_p2 = scmp.lt.s32.totalorder %s339_s4, %s334_s29 }
  0x12   : > { %p337_p13 = pnand %p336_p12, %p335_p11 }
  0x13   : > { %p342_p3 = por %p341_p2, %p340_p1 }
  0x14   : > { %p338_p0 = pneg %p337_p13 }
  0x16   : > { %p343_p4 = pnand %p342_p3, %p338_p0 }
  0x18   : > { %346 = shalt.err (!%p343_p4)
}
  0x19   : > { %s347_s7 = scalar_lea.vmem %s461_s26, 64  ;;  %s398_s8 = smov [#allocation2]  }
  0x1a   : > { %p348_p5 = scmp.ne.s32.totalorder %s461_s26, %s347_s7  ;;  %s352_s9 = sshll.u32 %s398_s8, 4  ;;  %s353_s9 = int_to_ptr.vmem [resolvable:$false] %s352_s9 }
  0x1b   : > { %s354_s15 = scalar_lea.vmem %s353_s9, 128  ;;  %p355_p13 = scmp.lt.s32.totalorder %s461_s26, %s353_s9 }
  0x1c   : > { %p350_p6 = pnand %p348_p5, %p336_p12  ;;  %p356_p9 = scmp.lt.s32.totalorder %s354_s15, %s347_s7 }
  0x1e   : > { %p351_p11 = pneg %p350_p6  ;;  %p357_p10 = por %p356_p9, %p355_p13 }
  0x20   : > { %p358_p7 = pnand %p357_p10, %p351_p11 }
  0x22   : > { %361 = shalt.err (!%p358_p7)
}
  0x23   : > { %300 = dma.hbm_to_vmem [thread:$0]  (!%p463_p8), %s459_s24, 64, %s461_s26, %s113_s28  }
  0x24   : > { %p523_p0 = scmp.lt.s32.totalorder %s396_s12, 3  ;;  %p524_p1 = scmp.ge.s32.totalorder %s396_s12, 1 }
  0x26   : > { %p129_p12 = pnand %p524_p1, %p523_p0 }
  0x27   : > { %s134_s16 = sand.u32 (!%p129_p12), 1, %s388_s10   ;;  %p525_p9 = scmp.ne.s32.totalorder (!%p129_p12), %s521_s18, 0 }
  0x28   : > { %132 = sbr.rel (%p129_p12) target bundleno = 197 (0xc5), region = 24  ;;  %s290_s19 = sshll.u32 (!%p129_p12), %s134_s16, 2 }
  0x29   : > { %s135_s20 = scalar_lea.sflag (!%p129_p12), [#allocation3], %s134_s16  ;;  %s138_s21 = scalar_lea.vmem (!%p129_p12), [#allocation2], %s290_s19 }
  0x2d   : > { %379 = dma.done.wait (%p525_p9), %s135_s20, 64  }
  0x2e   : > { %381 = vsyncadd (%p525_p9), %s135_s20, 4294967232  ;;  %vm171_vm0 = vcmask 125952   ;;  %v170_v0 = vld [vmem:[%s138_s21] sm:$0xf]  ;;  %p162_p7 = scmp.lt.s32.totalorder %s433_s13, 1  ;;  %vm185_vm1 = vcmask 3072  }
  0x2f   : > { %v172_v1 = vsel %vm171_vm0, %v170_v0, 0.0  ;;  %v177_v2 = vmul.f32 %v170_v0, %v170_v0 }
  0x30   : > { %173 = vadd.xlane.f32.xlu0 %v172_v1  ;;  %s531_s13 = smov (!%p162_p7, %s433_s13), 1 }
  0x31   : > { %v178_v3 = vsel %vm171_vm0, %v177_v2, 0.0  ;;  %s291_s12 = sshll.u32 %s531_s13, 2 }
  0x32   : > { %s165_s24 = scalar_lea.vmem %s518_s1, %s291_s12  ;;  %s169_s26 = scalar_lea.vmem %s519_s2, %s291_s12 }
  0x34   : > { %179 = vadd.xlane.f32.xlu0 %v178_v3 }
  0xb9   : > { %v174_v4 = vpop.xlane.xlu0 %173 }
  0xba   : > { %v176_v5 = vmul.f32 0.0625, %v174_v4 }
  0xbc   : > { %186 = vst.msk [vmem:[%s165_s24] sm:$0xf] %vm185_vm1, %v176_v5  ;;  %v182_v7 = vmul.f32 %v176_v5, %v176_v5 }
  0xbd   : > { %v180_v6 = vpop.xlane.xlu0 %179 }
  0xbe   : > { %v181_v8 = vmul.f32 0.0625, %v180_v6 }
  0xc0   : > { %v183_v9 = vsub.f32 %v181_v8, %v182_v7 }
  0xc2   : > { %v184_v10 = vmax.f32 %v183_v9, 0.0 }
  0xc4   : > { %187 = vst.msk [vmem:[%s169_s26] sm:$0xf] %vm185_vm1, %v184_v10 }
  0xc5 PF: > { %p13_p8 = scmp.ge.s32.totalorder %s436_s14, 4   ;;  %s526_s9 = smov %s388_s10 }
  0xc6   : > { %s527_s10 = smov %s392_s11  ;;  %s528_s11 = smov %s446_s17 }
  0xc7   : > { %s529_s12 = smov %s436_s14  ;;  %15 = sbr.rel (!%p13_p8) target bundleno = 3 (0x3), region = 76 }
  0xcc   :  { %221 = vsyncpa [#allocation3], 1 }
  0xcd   :  { %223 = vsyncpa [#allocation3 + $0x1], 1 }

</bundles_post_ra>
